<compile_context>
chip_gen: v6e
topology: v6e:2x2x1
jax: 0.10.0
libtpu: 0.0.40
codegen_flags: <defaults>
</compile_context>

<pallas_src>
import functools

import jax
import jax.numpy as jnp
from jax import lax
from jax.experimental import pallas as pl
from jax.experimental.pallas import tpu as pltpu


def _flatten_fc_kernel(x_ref, w_ref, b_ref, o_ref):
    """One grid step over the K (reduction) axis.

    x_ref : (B, tk)        flattened-input tile
    w_ref : (out_dim, tk)  weight tile in PyTorch (N, K) layout
    b_ref : (1, out_dim)   bias (same block every step)
    o_ref : (B, out_dim)   f32 output tile, resident across the K axis
                           (doubles as the accumulator)
    """
    k = pl.program_id(0)

    @pl.when(k == 0)
    def _():
        o_ref[...] = jnp.zeros_like(o_ref)

    # x_tile @ W_tile.T without ever transposing W in HBM:
    # contract dim 1 of x (tk) with dim 1 of w (tk) -> (B, out_dim), f32 on MXU.
    o_ref[...] += lax.dot_general(
        x_ref[...],
        w_ref[...],
        dimension_numbers=(((1,), (1,)), ((), ())),
        preferred_element_type=jnp.float32,
    )

    @pl.when(k == pl.num_programs(0) - 1)
    def _():
        o_ref[...] += b_ref[...]


def _pick_tk(B, K, N, itemsize=4, budget_bytes=16 << 20):
    """Largest divisor of K whose double-buffered tiles fit the VMEM budget.

    Budget is kept conservative (16 MiB) so it stays well inside the default
    scoped VMEM limit on every generation, including v7x (32 MiB scoped /
    64 MiB physical).
    """
    resident = (B * N + N) * itemsize  # output block + bias (single-buffered-ish)
    for tk in range(K, 0, -1):
        if K % tk:
            continue
        need = 2 * (B + N) * tk * itemsize + resident  # double-buffered in tiles
        if need <= budget_bytes:
            return tk
    return K


@functools.partial(jax.jit, static_argnames=("tk",))
def flatten_forward(x, weight, bias, *, tk=None):
    """Equivalent of Flatten.forward.

    x      : (B, C, H, W)  float32
    weight : (out_dim, K)  float32   (PyTorch nn.Linear layout, NOT transposed)
    bias   : (out_dim,)    float32
    returns: (B, out_dim)  float32
    """
    B = x.shape[0]
    K = 1
    for d in x.shape[1:]:
        K *= d
    out_dim = weight.shape[0]

    # Flatten: row-major reshape == torch .view on contiguous input (no copy).
    x_flat = jnp.reshape(x, (B, K))
    b2d = jnp.reshape(bias, (1, out_dim))  # 2D for TPU layout

    if tk is None:
        tk = _pick_tk(B, K, out_dim)
    assert K % tk == 0, "reduction dim must be a multiple of the K tile"
    grid = (K // tk,)  # == (1,) for the test size: no grid-step overhead

    # NOTE: out_dim=32 < 128 lanes and B=2 < 8 sublanes means the single output
    # store is masked / sub-(8,128); padding would cost a wrapper-side HBM copy
    # of the weight, which is worse at this size.  For large out_dim, add a
    # 128-aligned "parallel" N grid axis (2-TC megacore on v7x).
    return pl.pallas_call(
        _flatten_fc_kernel,
        out_shape=jax.ShapeDtypeStruct((B, out_dim), jnp.float32),
        grid_spec=pltpu.PrefetchScalarGridSpec(
            num_scalar_prefetch=0,
            grid=grid,
            in_specs=[
                pl.BlockSpec((B, tk), lambda k: (0, k)),          # x_flat tile
                pl.BlockSpec((out_dim, tk), lambda k: (0, k)),    # weight tile (N, K)
                pl.BlockSpec((1, out_dim), lambda k: (0, 0)),     # bias (fixed)
            ],
            out_specs=pl.BlockSpec((B, out_dim), lambda k: (0, 0)),
        ),
        compiler_params=pltpu.CompilerParams(
            dimension_semantics=("arbitrary",),  # K is a reduction axis
        ),
    )(x_flat, weight, b2d)


if __name__ == "__main__":
    # Module config (synthetic, deterministic init — no checkpoint loading)
    B, C, H, W = 2, 4, 16, 16
    out_dim = 32
    K = C * H * W  # flatten_dim = 1024

    key = jax.random.PRNGKey(0)
    kx, kw, kb = jax.random.split(key, 3)

    x = jax.random.normal(kx, (B, C, H, W), dtype=jnp.float32)

    # nn.Linear(K, out_dim) default init: U(-1/sqrt(K), 1/sqrt(K))
    bound = 1.0 / (K ** 0.5)
    weight = jax.random.uniform(
        kw, (out_dim, K), minval=-bound, maxval=bound, dtype=jnp.float32
    )
    bias = jax.random.uniform(
        kb, (out_dim,), minval=-bound, maxval=bound, dtype=jnp.float32
    )

    out = flatten_forward(x, weight, bias)
    out = jax.block_until_ready(out)

    # Correctness check against the pure-JAX reference of the PyTorch forward
    ref = jnp.reshape(x, (B, K)) @ weight.T + bias
    assert out.shape == (B, out_dim)
    assert jnp.allclose(out, ref, atol=1e-4, rtol=1e-4)

    print("KERNEL_OK")
</pallas_src>

<mosaic_0001>
module attributes {stable_mosaic.version = 11 : i64} {
  func.func @_flatten_fc_kernel(%arg0: i32, %arg1: memref<2x1024xf32, #tpu.memory_space<vmem>>, %arg2: memref<32x1024xf32, #tpu.memory_space<vmem>>, %arg3: memref<1x32xf32, #tpu.memory_space<vmem>>, %arg4: memref<2x32xf32, #tpu.memory_space<vmem>>) attributes {dimension_semantics = [#tpu.dimension_semantics<arbitrary>], iteration_bounds = array<i64: 1>, scalar_prefetch = 0 : i64, scratch_operands = 0 : i64, tpu.core_type = #tpu.core_type<tc>, window_params = [{transform_indices = @transform_0, window_bounds = array<i64: 2, 1024>}, {transform_indices = @transform_1, window_bounds = array<i64: 32, 1024>}, {pipeline_mode = #tpu.pipeline_mode<synchronous>, transform_indices = @transform_2, window_bounds = array<i64: 1, 32>}, {pipeline_mode = #tpu.pipeline_mode<synchronous>, transform_indices = @transform_3, window_bounds = array<i64: 2, 32>}]} {
    %c0_i32 = arith.constant 0 : i32
    %0 = arith.cmpi eq, %arg0, %c0_i32 : i32
    %1 = arith.extui %0 : i1 to i32
    %c0_i32_0 = arith.constant 0 : i32
    %2 = arith.cmpi ne, %1, %c0_i32_0 : i32
    scf.if %2 {
      %cst_10 = arith.constant 0.000000e+00 : f32
      %12 = vector.broadcast %cst_10 : f32 to vector<2x32xf32>
      %c0_11 = arith.constant 0 : index
      %c0_12 = arith.constant 0 : index
      %13 = vector.load %arg4[%c0_11, %c0_12] : memref<2x32xf32, #tpu.memory_space<vmem>>, vector<2x32xf32>
      tpu.vector_store %arg4[%c0_11, %c0_12], %12 {strides = array<i32>} : memref<2x32xf32, #tpu.memory_space<vmem>>, vector<2x32xf32>,
    } else {
    }
    %c0 = arith.constant 0 : index
    %c0_1 = arith.constant 0 : index
    %3 = vector.load %arg4[%c0, %c0_1] : memref<2x32xf32, #tpu.memory_space<vmem>>, vector<2x32xf32>
    %c0_2 = arith.constant 0 : index
    %c0_3 = arith.constant 0 : index
    %4 = vector.load %arg1[%c0_2, %c0_3] : memref<2x1024xf32, #tpu.memory_space<vmem>>, vector<2x1024xf32>
    %c0_4 = arith.constant 0 : index
    %c0_5 = arith.constant 0 : index
    %5 = vector.load %arg2[%c0_4, %c0_5] : memref<32x1024xf32, #tpu.memory_space<vmem>>, vector<32x1024xf32>
    %cst = arith.constant dense<0.000000e+00> : vector<2x32xf32>
    %6 = tpu.matmul %4, %5, %cst {dimension_numbers = #tpu.dot_dimension_numbers<[1], [1], [0], [0], [0, 0, 1, 0], [], []>} : vector<2x1024xf32>, vector<32x1024xf32>, vector<2x32xf32> -> vector<2x32xf32>
    %7 = arith.addf %3, %6 : vector<2x32xf32>
    %c0_6 = arith.constant 0 : index
    %c0_7 = arith.constant 0 : index
    %8 = vector.load %arg4[%c0_6, %c0_7] : memref<2x32xf32, #tpu.memory_space<vmem>>, vector<2x32xf32>
    tpu.vector_store %arg4[%c0_6, %c0_7], %7 {strides = array<i32>} : memref<2x32xf32, #tpu.memory_space<vmem>>, vector<2x32xf32>,
    %c0_i32_8 = arith.constant 0 : i32
    %9 = arith.cmpi eq, %arg0, %c0_i32_8 : i32
    %10 = arith.extui %9 : i1 to i32
    %c0_i32_9 = arith.constant 0 : i32
    %11 = arith.cmpi ne, %10, %c0_i32_9 : i32
    scf.if %11 {
      %c0_10 = arith.constant 0 : index
      %c0_11 = arith.constant 0 : index
      %12 = vector.load %arg4[%c0_10, %c0_11] : memref<2x32xf32, #tpu.memory_space<vmem>>, vector<2x32xf32>
      %c0_12 = arith.constant 0 : index
      %c0_13 = arith.constant 0 : index
      %13 = vector.load %arg3[%c0_12, %c0_13] : memref<1x32xf32, #tpu.memory_space<vmem>>, vector<1x32xf32>
      %14 = vector.broadcast %13 : vector<1x32xf32> to vector<2x32xf32>
      %15 = arith.addf %12, %14 : vector<2x32xf32>
      %c0_14 = arith.constant 0 : index
      %c0_15 = arith.constant 0 : index
      %16 = vector.load %arg4[%c0_14, %c0_15] : memref<2x32xf32, #tpu.memory_space<vmem>>, vector<2x32xf32>
      tpu.vector_store %arg4[%c0_14, %c0_15], %15 {strides = array<i32>} : memref<2x32xf32, #tpu.memory_space<vmem>>, vector<2x32xf32>,
    } else {
    }
    return
  }
  func.func @transform_0(%arg0: i32) -> (i32, i32) {
    %c0_i32 = arith.constant 0 : i32
    %c0_i32_0 = arith.constant 0 : i32
    return %c0_i32, %arg0 : i32, i32
  }
  func.func @transform_1(%arg0: i32) -> (i32, i32) {
    %c0_i32 = arith.constant 0 : i32
    %c0_i32_0 = arith.constant 0 : i32
    return %c0_i32, %arg0 : i32, i32
  }
  func.func @transform_2(%arg0: i32) -> (i32, i32) {
    %c0_i32 = arith.constant 0 : i32
    %c0_i32_0 = arith.constant 0 : i32
    %c0_i32_1 = arith.constant 0 : i32
    return %c0_i32, %c0_i32_0 : i32, i32
  }
  func.func @transform_3(%arg0: i32) -> (i32, i32) {
    %c0_i32 = arith.constant 0 : i32
    %c0_i32_0 = arith.constant 0 : i32
    %c0_i32_1 = arith.constant 0 : i32
    return %c0_i32, %c0_i32_0 : i32, i32
  }
}

</mosaic_0001>

<bundles_post_ra>
// kernel: flatten_forward.1
= control target key start
LH: loop header
LB: loop body
LE: loop exit
PB: predicated region body
PF: predicated region fallthrough
CT: control target
= control target key end

     0   :  { %8 = vsyncpa [#allocation3], 0  ;;  %s522_s0 = inlined_call_operand.vmem [shape: f32[2,1024], index: 0, kind: input, shape index: {}]   ;;  %s523_s1 = inlined_call_operand.hbm [shape: f32[32,1024], index: 1, kind: input, shape index: {}]   ;;  %s524_s2 = inlined_call_operand.vmem [shape: f32[1,32], index: 2, kind: input, shape index: {}]   ;;  %s525_s3 = inlined_call_operand.hbm [shape: f32[2,32], index: 3, kind: output, shape index: {}]  }
   0x1   :  { %9 = vsyncpa [#allocation4], 0  ;;  %s478_s12 = smov [#allocation2]  }
   0x2   :  { %s17_s13 = sshll.u32 %s478_s12, 4  ;;  %s18_s13 = int_to_ptr.vmem [resolvable:$true] %s17_s13 }
   0x3   :  { %s442_s14 = scalar_lea.vmem %s18_s13, 4096  ;;  %p447_p1 = scmp.lt.s32.totalorder %s18_s13, %s18_s13 }
   0x4   :  { %p443_p0 = scmp.ne.s32.totalorder %s18_s13, %s442_s14  ;;  %p448_p2 = scmp.lt.s32.totalorder %s442_s14, %s442_s14 }
   0x6   :  { %p449_p3 = por %p448_p2, %p447_p1 }
   0x8   :  { %p450_p4 = pnand %p449_p3, %p443_p0 }
   0xa   :  { %453 = shalt.err (!%p450_p4)
}
   0xb   :  { %s479_s15 = smov 1024   ;;  %s480_s16 = smov 64  }
   0xc   :  { %23 = dma.hbm_to_vmem [thread:$0]  %s523_s1, 4096, %s18_s13, [#allocation3], %s479_s15, %s479_s15, %s480_s16  }
   0xd   :  { %474 = dma.done.wait [#allocation3], 4096  }
   0xe   :  { %475 = vsyncadd [#allocation3], 4294963200  ;;  %v481_v0 = vmov 1983009808   ;;  %v76_v2 = vlaneseq  ;;  %v63_v5 = vld [vmem:[#allocation2 + $0xc8] sm:$0xff]  ;;  %v65_v6 = vld [vmem:[#allocation2 + $0xd8] sm:$0xff] }
   0xf   :  { %v74_v1 = vunpack.c.l.s4 %v481_v0  ;;  %v62_v7 = vld [vmem:[#allocation2 + $0xc0] sm:$0xff]  ;;  %138 = vmatprep.subr.mxu0 %v63_v5  ;;  %208 = vmatprep.subr.mxu1 %v65_v6  ;;  %v64_v8 = vld [vmem:[#allocation2 + $0xd0] sm:$0xff]  ;;  %v55_v9 = vld [vmem:[#allocation2 + $0x88] sm:$0xff]  ;;  %vm33_vm0 = vcmask 254976   ;;  %v482_v50 = vmov 0.0   ;;  %s483_s23 = smov [#allocation5]  }
  0x10   :  { %v77_v4 = vshrl.u32 %v76_v2, 7  ;;  %v57_v10 = vld [vmem:[#allocation2 + $0x98] sm:$0xff]  ;;  %139 = vmatpush1.xpose.msra.mxu0 %v62_v7  ;;  %209 = vmatpush1.xpose.msra.mxu1 %v64_v8  ;;  %v54_v12 = vld [vmem:[#allocation2 + $0x80] sm:$0xff]  ;;  %v56_v13 = vld [vmem:[#allocation2 + $0x90] sm:$0xff]  ;;  %34 = vst.msk [vmem:[#allocation5] sm:$0x3] %vm33_vm0, %v482_v50 }
  0x11   :  { %v75_v3 = vunpack.c.0.s8 %v74_v1  ;;  %140 = vmatprep.subr.mxu0 %v55_v9  ;;  %210 = vmatprep.subr.mxu1 %v57_v10  ;;  %v47_v14 = vld [vmem:[#allocation2 + $0x48] sm:$0xff]  ;;  %v49_v15 = vld [vmem:[#allocation2 + $0x58] sm:$0xff]  ;;  %v36_v16 = vld [vmem:[%s522_s0] sm:$0xff]  ;;  %s416_s24 = sshll.u32 %s483_s23, 4  ;;  %s417_s24 = int_to_ptr.vmem [resolvable:$true] %s416_s24 }
  0x12   :  { %v72_v18 = vcombine.high %v36_v16, %v36_v16  ;;  %v46_v19 = vld [vmem:[#allocation2 + $0x40] sm:$0xff]  ;;  %v48_v20 = vld [vmem:[#allocation2 + $0x50] sm:$0xff]  ;;  %v39_v21 = vld [vmem:[#allocation2 + $0x8] sm:$0xff]  ;;  %s454_s25 = scalar_lea.vmem %s417_s24, 32  ;;  %p459_p6 = scmp.lt.s32.totalorder %s417_s24, %s417_s24 }
  0x13   :  { %v78_v11 = vsub.s32 %v75_v3, %v77_v4  ;;  %v41_v22 = vld [vmem:[#allocation2 + $0x18] sm:$0xff]  ;;  %v38_v26 = vld [vmem:[#allocation2] sm:$0xff]  ;;  %v40_v27 = vld [vmem:[#allocation2 + $0x10] sm:$0xff]  ;;  %p455_p5 = scmp.ne.s32.totalorder %s417_s24, %s454_s25  ;;  %p460_p7 = scmp.lt.s32.totalorder %s454_s25, %s454_s25 }
  0x14   :  { %141 = vmatpush1.xpose.msra.mxu0 %v54_v12  ;;  %211 = vmatpush1.xpose.msra.mxu1 %v56_v13  ;;  %v37_v28 = vld [vmem:[%s522_s0 + $0x8] sm:$0xff]  ;;  %v69_v30 = vld [vmem:[#allocation2 + $0xf8] sm:$0xff]  ;;  %v66_v34 = vld [vmem:[#allocation2 + $0xe0] sm:$0xff] }
  0x15   :  { %v79_v17 = vrot.slane %v36_v16, %v78_v11  ;;  %142 = vmatprep.subr.mxu0 %v47_v14  ;;  %212 = vmatprep.subr.mxu1 %v49_v15  ;;  %v86_v24 = vrot.slane %v72_v18, %v78_v11  ;;  %v67_v29 = vld [vmem:[#allocation2 + $0xe8] sm:$0xff]  ;;  %v96_v31 = vrot.slane %v37_v28, %v78_v11  ;;  %v68_v35 = vld [vmem:[#allocation2 + $0xf0] sm:$0xff]  ;;  %v61_v37 = vld [vmem:[#allocation2 + $0xb8] sm:$0xff]  ;;  %p461_p8 = por %p460_p7, %p459_p6 }
  0x16   :  { %v89_v32 = vcombine.high %v37_v28, %v37_v28  ;;  %v59_v36 = vld [vmem:[#allocation2 + $0xa8] sm:$0xff]  ;;  %v58_v40 = vld [vmem:[#allocation2 + $0xa0] sm:$0xff]  ;;  %v60_v41 = vld [vmem:[#allocation2 + $0xb0] sm:$0xff] }
  0x17   :  { %v87_v23 = vcombine.high %v79_v17, %v79_v17  ;;  %v88_v25 = vcombine.high %v86_v24, %v86_v24  ;;  %v104_v38 = vcombine.high %v96_v31, %v96_v31  ;;  %v51_v42 = vld [vmem:[#allocation2 + $0x68] sm:$0xff]  ;;  %v53_v43 = vld [vmem:[#allocation2 + $0x78] sm:$0xff]  ;;  %v50_v44 = vld [vmem:[#allocation2 + $0x60] sm:$0xff]  ;;  %p462_p9 = pnand %p461_p8, %p455_p5 }
  0x18   :  { %143 = vmatpush1.xpose.msra.mxu0 %v46_v19  ;;  %213 = vmatpush1.xpose.msra.mxu1 %v48_v20  ;;  %v103_v33 = vrot.slane %v89_v32, %v78_v11  ;;  %v52_v45 = vld [vmem:[#allocation2 + $0x70] sm:$0xff]  ;;  %v43_v46 = vld [vmem:[#allocation2 + $0x28] sm:$0xff]  ;;  %v45_v47 = vld [vmem:[#allocation2 + $0x38] sm:$0xff] }
  0x19   :  { %144 = vmatprep.subr.mxu0 %v39_v21  ;;  %214 = vmatprep.subr.mxu1 %v41_v22  ;;  %v42_v48 = vld [vmem:[#allocation2 + $0x20] sm:$0xff]  ;;  %v44_v49 = vld [vmem:[#allocation2 + $0x30] sm:$0xff] }
  0x1a   :  { %178 = vmatprep.mubr.f32.mxu0 %v87_v23  ;;  %248 = vmatprep.mubr.f32.mxu1 %v88_v25  ;;  %v105_v39 = vcombine.high %v103_v33, %v103_v33  ;;  %v35_v59 = vld [vmem:[#allocation5] sm:$0x3] }
  0x1b   :  { %v425_v0 = vld [vmem:[%s524_s2] ss:$0 sm:$0xff] }
  0x1c   :  { %145 = vmatpush1.xpose.msra.mxu0 %v38_v26  ;;  %215 = vmatpush1.xpose.msra.mxu1 %v40_v27 }
  0x1d   :  { %278 = vmatprep.subr.mxu0 %v67_v29  ;;  %348 = vmatprep.subr.mxu1 %v69_v30 }
  0x1f   :  { %179 = vmatmul.mubr.f32.vlgmr.msra.gmra.mxu0 %v79_v17  ;;  %249 = vmatmul.mubr.f32.vlgmr.msra.gmra.mxu1 %v86_v24 }
  0x20   :  { %279 = vmatpush1.xpose.msra.mxu0 %v66_v34  ;;  %349 = vmatpush1.xpose.msra.mxu1 %v68_v35 }
  0x21   :  { %280 = vmatprep.subr.mxu0 %v59_v36  ;;  %350 = vmatprep.subr.mxu1 %v61_v37 }
  0x22   :  { %318 = vmatprep.mubr.f32.mxu0 %v104_v38  ;;  %388 = vmatprep.mubr.f32.mxu1 %v105_v39 }
  0x24   :  { %281 = vmatpush1.xpose.msra.mxu0 %v58_v40  ;;  %351 = vmatpush1.xpose.msra.mxu1 %v60_v41 }
  0x25   :  { %282 = vmatprep.subr.mxu0 %v51_v42  ;;  %352 = vmatprep.subr.mxu1 %v53_v43 }
  0x28   :  { %283 = vmatpush1.xpose.msra.mxu0 %v50_v44  ;;  %353 = vmatpush1.xpose.msra.mxu1 %v52_v45 }
  0x29   :  { %284 = vmatprep.subr.mxu0 %v43_v46  ;;  %354 = vmatprep.subr.mxu1 %v45_v47 }
  0x2c   :  { %285 = vmatpush1.xpose.msra.mxu0 %v42_v48  ;;  %355 = vmatpush1.xpose.msra.mxu1 %v44_v49 }
  0x2f   :  { %319 = vmatmul.mubr.f32.vlgmr.msra.gmra.mxu0 %v96_v31  ;;  %389 = vmatmul.mubr.f32.vlgmr.msra.gmra.mxu1 %v103_v33 }
  0xdf   :  { %v180_v51 = vpop.f32.mrf.mxu0  ;;  %v250_v52 = vpop.f32.mrf.mxu1 }
  0xe0   :  { %v251_v55 = vadd.f32 %v250_v52, %v180_v51 }
  0xe1   :  { %v182_v53 = vpop.f32.mrf.mxu0  ;;  %v252_v54 = vpop.f32.mrf.mxu1 }
  0xef   :  { %v320_v56 = vpop.f32.mrf.mxu0  ;;  %v390_v57 = vpop.f32.mrf.mxu1 }
  0xf0   :  { %v321_v58 = vadd.f32 %v320_v56, %v251_v55 }
  0xf1   :  { %v322_v60 = vpop.f32.mrf.mxu0  ;;  %v392_v61 = vpop.f32.mrf.mxu1 }
  0xf2   :  { %v391_v62 = vadd.f32 %v390_v57, %v321_v58 }
  0xf4   :  { %v394_v63 = vadd.f32 %v391_v62, %v35_v59 }
  0xf6   :  { %396 = vst.msk [vmem:[#allocation5] sm:$0x3] %vm33_vm0, %v394_v63 }
  0xfd   :  { %v400_v1 = vld [vmem:[#allocation5] sm:$0x3] }
  0xfe   :  { %v408_v2 = vadd.f32 %v425_v0, %v400_v1 }
 0x100   :  { %409 = vst.msk [vmem:[#allocation5] sm:$0x3] %vm33_vm0, %v408_v2 }
 0x101   :  { %465 = shalt.err (!%p462_p9)
}
 0x102   :  { %419 = dma.vmem_to_hbm [thread:$0]  %s417_s24, 32, %s525_s3, [#allocation4]  }
 0x103   :  { %476 = dma.done.wait [#allocation4], 32  }
 0x104   :  { %477 = vsyncadd [#allocation4], 4294967264 }
 0x105   :  { %423 = vsyncpa [#allocation3], 1 }
 0x106   :  { %424 = vsyncpa [#allocation4], 1 }

</bundles_post_ra>
